<compile_context>
chip_gen: v7x
topology: tpu7x:2x2x1
jax: 0.10.0
libtpu: 0.0.40
codegen_flags: <defaults>
</compile_context>

<pallas_src>
import functools

import jax
import jax.numpy as jnp
from jax.experimental import pallas as pl
from jax.experimental.pallas import tpu as pltpu

DEAD = -40.0          # dead-lane logit: sigmoid(-40) ~ 4.2e-18, finite (no inf/NaN path)
BIAS_PAD_ROWS = 8     # single b0 row padded to one sublane-aligned block


def _round_up(n, m):
    return ((n + m - 1) // m) * m


def _lane_width(layers):
    """Smallest supported slab lane width (64 or 128) incl. one constant-one lane."""
    _, D1, D2, D3 = layers
    need = max(D1, D2, D3 + 1) + 1          # +1 for the constant-one lane
    assert need <= 128, "hidden widths this large are not supported by this packing"
    return 64 if need <= 64 else 128


def _offsets(layers, lanes):
    D0 = layers[0]
    o0 = 0
    o1 = o0 + D0          # fc0 block : rows [o0, o1)
    o2 = o1 + lanes       # fc1 block : rows [o1, o2)
    o3 = o2 + lanes       # fc2 block : rows [o2, o3)
    ob = o3 + lanes       # fc_final  : rows [o3, ob);  b0 row at `ob`
    rows = ob + BIAS_PAD_ROWS
    return o0, o1, o2, o3, ob, rows


def _mlp_kernel(x_ref, p_ref, out_ref, *, o0, o1, o2, o3, ob):
    """One batch tile.  p_ref is the packed (p_rows, lanes) parameter slab (resident).

    Packing invariants (see pack_params):
      * every weight block is zero outside its live rows/cols, so padded lanes stay
        exactly zero through the matmuls;
      * lane `lanes-1` of every activation is a constant 1.0 (seeded by the b0 row,
        propagated by a 1.0 on each folded-bias row), so b1/b2/bf ride inside the
        matmuls -- no per-layer bias adds or broadcast relayouts;
      * the fc_final block puts the logit in lane D3 and DEAD in every other lane, so
        sigmoid of dead lanes is ~4e-18 and the store is just `h2 + sig` -- no
        iota/compare/select masking and a single unmasked-per-row lane-dense store.
    """
    x = x_ref[...]                                                      # (tm, D0) f32

    # fc0 + ReLU; the b0 row also seeds the constant-one lane.
    h = jnp.dot(x, p_ref[o0:o1, :], preferred_element_type=jnp.float32)
    h = jnp.maximum(h + p_ref[ob:ob + 1, :], 0.0)
    # fc1 + ReLU (bias folded via const lane)
    h = jnp.maximum(
        jnp.dot(h, p_ref[o1:o2, :], preferred_element_type=jnp.float32), 0.0)
    # fc2 -> hidden (pre-ReLU) in lanes [0:D3); const lane stays 1; other lanes 0
    h2 = jnp.dot(h, p_ref[o2:o3, :], preferred_element_type=jnp.float32)
    # ReLU then fc_final: logit lands in lane D3, every other lane = DEAD
    logits = jnp.dot(jnp.maximum(h2, 0.0), p_ref[o3:ob, :],
                     preferred_element_type=jnp.float32)
    # sigmoid = 1/(1+exp(-x)): exp on EUP + exact reciprocal; dead lanes -> ~4e-18
    sig = pl.reciprocal(1.0 + jnp.exp(-logits))
    out_ref[...] = (h2 + sig).astype(out_ref.dtype)


def pack_params(params, layers):
    """Pack (w,b) pairs into one (p_rows, lanes) f32 slab, zero-padded, sublane-aligned.

    rows [o0:o1)  : w0 in cols [0:D1)                 (const-lane col stays 0)
    rows [o1:o2)  : w1 in cols [0:D2); row o1+C = [b1 | 1 in col C]
    rows [o2:o3)  : w2 in cols [0:D3); row o2+C = [b2 | 1 in col C]
    rows [o3:ob)  : wf in col D3     ; row o3+C = [DEAD everywhere | bf in col D3]
    row   ob      : b0 in cols [0:D1), 1.0 in col C   (7 zero pad rows follow)
    where C = lanes-1 is the constant-one lane.
    """
    D0, D1, D2, D3 = layers
    assert D0 % 8 == 0, "input feature dim must be a multiple of 8"
    lanes = _lane_width(layers)
    C = lanes - 1
    assert C >= max(D1, D2, D3 + 1)
    (w0, b0), (w1, b1), (w2, b2), (wf, bf) = params

    o0, o1, o2, o3, ob, rows = _offsets(layers, lanes)

    slab = jnp.zeros((rows, lanes), jnp.float32)
    # fc0
    slab = slab.at[o0:o0 + D0, :D1].set(w0)
    # fc1 (+ b1 folded, const lane propagated)
    slab = slab.at[o1:o1 + D1, :D2].set(w1)
    slab = slab.at[o1 + C, :D2].set(b1)
    slab = slab.at[o1 + C, C].set(1.0)
    # fc2 (+ b2 folded, const lane propagated)
    slab = slab.at[o2:o2 + D2, :D3].set(w2)
    slab = slab.at[o2 + C, :D3].set(b2)
    slab = slab.at[o2 + C, C].set(1.0)
    # fc_final: logit in lane D3, DEAD everywhere else (kills dead-lane sigmoids)
    slab = slab.at[o3:o3 + D3, D3:D3 + 1].set(wf)
    slab = slab.at[o3 + C, :].set(DEAD)
    slab = slab.at[o3 + C, D3].set(bf[0])
    # b0 row; lane C = 1 seeds the constant-one lane
    slab = slab.at[ob, :D1].set(b0)
    slab = slab.at[ob, C].set(1.0)
    return slab


def mt_tsnl_net_forward(x, p_slab, layers, *, tm_cap=1024):
    """x: (B, D0) f32, p_slab from pack_params.  Returns (out (B,1), hidden (B,D3))."""
    D0, D1, D2, D3 = layers
    B = x.shape[0]
    assert x.shape[1] == D0
    lanes = _lane_width(layers)

    # Batch tiling: n_tiles = ceil(B / cap), tm = round_up(ceil(B / n_tiles), 8) so the
    # padded batch Bp = n_tiles*tm never balloons past B by more than the 8-row round.
    n_tiles = max(1, -(-B // tm_cap))
    tm = _round_up(-(-B // n_tiles), 8)
    Bp = n_tiles * tm
    if Bp != B:
        x = jnp.pad(x, ((0, Bp - B), (0, 0)))

    o0, o1, o2, o3, ob, p_rows = _offsets(layers, lanes)
    assert p_slab.shape == (p_rows, lanes)

    kernel = functools.partial(_mlp_kernel, o0=o0, o1=o1, o2=o2, o3=o3, ob=ob)

    # Count the padded (lane-width) work, not logical dims, so XLA's scheduling hint
    # reflects reality.
    cost = pl.CostEstimate(
        flops=2 * Bp * lanes * (D0 + 3 * lanes),
        transcendentals=Bp * lanes,
        bytes_accessed=Bp * (D0 + lanes) * 4 + p_rows * lanes * 4,
    )

    slab = pl.pallas_call(
        kernel,
        out_shape=jax.ShapeDtypeStruct((Bp, lanes), jnp.float32),
        grid_spec=pltpu.PrefetchScalarGridSpec(
            num_scalar_prefetch=0,
            grid=(n_tiles,),
            in_specs=[
                pl.BlockSpec((tm, D0), lambda i: (i, 0)),           # streamed x tile
                pl.BlockSpec((p_rows, lanes), lambda i: (0, 0)),    # resident params
            ],
            out_specs=pl.BlockSpec((tm, lanes), lambda i: (i, 0)),  # 64-lane slab
        ),
        compiler_params=pltpu.CompilerParams(
            dimension_semantics=("parallel",),
            vmem_limit_bytes=32 * 1024 * 1024,   # explicit: safe on v5e's 16 MiB default
        ),
        cost_estimate=cost,
    )(x, p_slab)

    # NOTE: these slices are thin post-kernel copies; callers that can consume the
    # packed slab directly should do so (out in lane D3, hidden in lanes [0:D3)).
    out = slab[:B, D3:D3 + 1]     # sigmoid(fc_final(relu(hidden)))
    hidden = slab[:B, :D3]        # fc2 output, pre-ReLU (matches torch)
    return out, hidden


def init_params(key, layers):
    """kaiming_normal(mode='fan_out', nonlinearity='relu'), zero biases.

    PyTorch weight is (out, in) with fan_out = out; std = sqrt(2/fan_out).
    Weights stored transposed (in, out) for row-major kernel matmuls.
    """
    dims = list(layers) + [1]  # fc0, fc1, fc2, fc_final
    keys = jax.random.split(key, 4)
    params = []
    for k, d_in, d_out in zip(keys, dims[:-1], dims[1:]):
        std = (2.0 / d_out) ** 0.5
        w = std * jax.random.normal(k, (d_in, d_out), dtype=jnp.float32)
        b = jnp.zeros((d_out,), dtype=jnp.float32)
        params.append((w, b))
    return params


if __name__ == "__main__":
    layers = (16, 32, 32, 32)   # layers[0..3] as in the module constructor
    batch = 8

    key = jax.random.PRNGKey(0)
    kx, kp = jax.random.split(key)
    x = jax.random.normal(kx, (batch, layers[0]), dtype=jnp.float32)
    params = init_params(kp, layers)
    p_slab = pack_params(params, layers)

    fwd = jax.jit(functools.partial(mt_tsnl_net_forward, layers=layers))
    out, hidden = fwd(x, p_slab)
    jax.block_until_ready((out, hidden))

    # Pure-JAX reference (same math, same params).
    (w0, b0), (w1, b1), (w2, b2), (wf, bf) = params
    h0 = jnp.maximum(x @ w0 + b0, 0.0)
    h1 = jnp.maximum(h0 @ w1 + b1, 0.0)
    h2 = h1 @ w2 + b2                              # hidden (pre-ReLU)
    ref_out = jax.nn.sigmoid(jnp.maximum(h2, 0.0) @ wf + bf)

    assert out.shape == (batch, 1) and hidden.shape == (batch, layers[3])
    assert jnp.allclose(hidden, h2, atol=1e-5), "hidden mismatch"
    assert jnp.allclose(out, ref_out, atol=1e-5), "output mismatch"

    print("KERNEL_OK")
</pallas_src>

<mosaic_0001>
module attributes {stable_mosaic.version = 11 : i64} {
  func.func @_mlp_kernel(%arg0: i32, %arg1: memref<8x16xf32, #tpu.memory_space<vmem>>, %arg2: memref<216x64xf32, #tpu.memory_space<vmem>>, %arg3: memref<8x64xf32, #tpu.memory_space<vmem>>) attributes {dimension_semantics = [#tpu.dimension_semantics<parallel>], iteration_bounds = array<i64: 1>, scalar_prefetch = 0 : i64, scratch_operands = 0 : i64, tpu.core_type = #tpu.core_type<tc>, window_params = [{transform_indices = @transform_0, window_bounds = array<i64: 8, 16>}, {pipeline_mode = #tpu.pipeline_mode<synchronous>, transform_indices = @transform_1, window_bounds = array<i64: 216, 64>}, {transform_indices = @transform_2, window_bounds = array<i64: 8, 64>}]} {
    %c0 = arith.constant 0 : index
    %c0_0 = arith.constant 0 : index
    %0 = vector.load %arg1[%c0, %c0_0] : memref<8x16xf32, #tpu.memory_space<vmem>>, vector<8x16xf32>
    %c0_1 = arith.constant 0 : index
    %c0_2 = arith.constant 0 : index
    %1 = vector.load %arg2[%c0_1, %c0_2] : memref<216x64xf32, #tpu.memory_space<vmem>>, vector<16x64xf32>
    %cst = arith.constant dense<0.000000e+00> : vector<8x64xf32>
    %2 = tpu.matmul %0, %1, %cst {dimension_numbers = #tpu.dot_dimension_numbers<[1], [0], [0], [1], [0, 0, 1, 1], [], []>} : vector<8x16xf32>, vector<16x64xf32>, vector<8x64xf32> -> vector<8x64xf32>
    %c208 = arith.constant 208 : index
    %c0_3 = arith.constant 0 : index
    %3 = vector.load %arg2[%c208, %c0_3] : memref<216x64xf32, #tpu.memory_space<vmem>>, vector<1x64xf32>
    %4 = vector.broadcast %3 : vector<1x64xf32> to vector<8x64xf32>
    %5 = arith.addf %2, %4 : vector<8x64xf32>
    %cst_4 = arith.constant 0.000000e+00 : f32
    %6 = vector.broadcast %cst_4 : f32 to vector<8x64xf32>
    %7 = arith.maximumf %5, %6 : vector<8x64xf32>
    %c16 = arith.constant 16 : index
    %c0_5 = arith.constant 0 : index
    %8 = vector.load %arg2[%c16, %c0_5] : memref<216x64xf32, #tpu.memory_space<vmem>>, vector<64x64xf32>
    %cst_6 = arith.constant dense<0.000000e+00> : vector<8x64xf32>
    %9 = tpu.matmul %7, %8, %cst_6 {dimension_numbers = #tpu.dot_dimension_numbers<[1], [0], [0], [1], [0, 0, 1, 1], [], []>} : vector<8x64xf32>, vector<64x64xf32>, vector<8x64xf32> -> vector<8x64xf32>
    %cst_7 = arith.constant 0.000000e+00 : f32
    %10 = vector.broadcast %cst_7 : f32 to vector<8x64xf32>
    %11 = arith.maximumf %9, %10 : vector<8x64xf32>
    %c80 = arith.constant 80 : index
    %c0_8 = arith.constant 0 : index
    %12 = vector.load %arg2[%c80, %c0_8] : memref<216x64xf32, #tpu.memory_space<vmem>>, vector<64x64xf32>
    %cst_9 = arith.constant dense<0.000000e+00> : vector<8x64xf32>
    %13 = tpu.matmul %11, %12, %cst_9 {dimension_numbers = #tpu.dot_dimension_numbers<[1], [0], [0], [1], [0, 0, 1, 1], [], []>} : vector<8x64xf32>, vector<64x64xf32>, vector<8x64xf32> -> vector<8x64xf32>
    %cst_10 = arith.constant 0.000000e+00 : f32
    %14 = vector.broadcast %cst_10 : f32 to vector<8x64xf32>
    %15 = arith.maximumf %13, %14 : vector<8x64xf32>
    %c144 = arith.constant 144 : index
    %c0_11 = arith.constant 0 : index
    %16 = vector.load %arg2[%c144, %c0_11] : memref<216x64xf32, #tpu.memory_space<vmem>>, vector<64x64xf32>
    %cst_12 = arith.constant dense<0.000000e+00> : vector<8x64xf32>
    %17 = tpu.matmul %15, %16, %cst_12 {dimension_numbers = #tpu.dot_dimension_numbers<[1], [0], [0], [1], [0, 0, 1, 1], [], []>} : vector<8x64xf32>, vector<64x64xf32>, vector<8x64xf32> -> vector<8x64xf32>
    %cst_13 = arith.constant 0.000000e+00 : f32
    %18 = vector.broadcast %cst_13 : f32 to vector<8x64xf32>
    %19 = arith.subf %18, %17 : vector<8x64xf32>
    %20 = math.exp %19 : vector<8x64xf32>
    %cst_14 = arith.constant 1.000000e+00 : f32
    %21 = vector.broadcast %cst_14 : f32 to vector<8x64xf32>
    %22 = arith.addf %21, %20 : vector<8x64xf32>
    %23 = tpu.reciprocal %22 : vector<8x64xf32> -> vector<8x64xf32>
    %24 = arith.addf %13, %23 : vector<8x64xf32>
    %c0_15 = arith.constant 0 : index
    %c0_16 = arith.constant 0 : index
    %25 = vector.load %arg3[%c0_15, %c0_16] : memref<8x64xf32, #tpu.memory_space<vmem>>, vector<8x64xf32>
    tpu.vector_store %arg3[%c0_15, %c0_16], %24 {strides = array<i32>} : memref<8x64xf32, #tpu.memory_space<vmem>>, vector<8x64xf32>,
    return
  }
  func.func @transform_0(%arg0: i32) -> (i32, i32) {
    %c0_i32 = arith.constant 0 : i32
    %c0_i32_0 = arith.constant 0 : i32
    return %arg0, %c0_i32 : i32, i32
  }
  func.func @transform_1(%arg0: i32) -> (i32, i32) {
    %c0_i32 = arith.constant 0 : i32
    %c0_i32_0 = arith.constant 0 : i32
    %c0_i32_1 = arith.constant 0 : i32
    return %c0_i32, %c0_i32_0 : i32, i32
  }
  func.func @transform_2(%arg0: i32) -> (i32, i32) {
    %c0_i32 = arith.constant 0 : i32
    %c0_i32_0 = arith.constant 0 : i32
    return %arg0, %c0_i32 : i32, i32
  }
}

</mosaic_0001>

<bundles_post_ra>
// kernel: mt_tsnl_net_forward.1
= control target key start
LH: loop header
LB: loop body
LE: loop exit
PB: predicated region body
PF: predicated region fallthrough
CT: control target
= control target key end

     0   :  { %v496_v0 = vmov 0.0|0.0   ;;  %vm497_vm0 = vmmov 0   ;;  %v498_v3 = vmov 0.0   ;;  %vm19_vm1 = vcmask 130048   ;;  %s622_s1 = inlined_call_operand.vmem [shape: f32[216,64], index: 1, kind: input, shape index: {}]   ;;  %s623_s0 = inlined_call_operand.vmem [shape: f32[8,16], index: 0, kind: input, shape index: {}]   ;;  %s624_s2 = inlined_call_operand.vmem [shape: f32[8,64], index: 2, kind: output, shape index: {}]  }
   0x1   :  { %450 = vmatprep.subr.bf16.mxu0 %v496_v0  ;;  %v12_v1 = vld [vmem:[%s622_s1] sm:$0xff]  ;;  %v13_v2 = vld [vmem:[%s622_s1 + $0x8] sm:$0xff]  ;;  %390 = vmatprep.mubr.msk.f32.mxu0 %vm497_vm0, %v498_v3  ;;  %v94_v5 = vld [vmem:[%s622_s1 + $0x10] sm:$0xff]  ;;  %vm102_vm2 = vcmask 523264  }
   0x2   :  { %v451_v4 = vpack.c.bf16 %v13_v2, %v12_v1  ;;  %453 = vmatprep.subr.bf16.mxu1 %v496_v0  ;;  %v95_v6 = vld [vmem:[%s622_s1 + $0x18] sm:$0xff]  ;;  %v96_v7 = vld [vmem:[%s622_s1 + $0x20] sm:$0xff]  ;;  %409 = vmatprep.mubr.msk.f32.mxu1 %vm497_vm0, %v498_v3  ;;  %v97_v9 = vld [vmem:[%s622_s1 + $0x28] sm:$0xff] }
   0x3   :  { %v454_v8 = vpack.c.bf16 %v95_v6, %v94_v5  ;;  %v11_v10 = vld [vmem:[%s623_s0] sm:$0xff]  ;;  %v457_v11 = vpack.c.bf16 %v97_v9, %v96_v7  ;;  %v98_v12 = vld [vmem:[%s622_s1 + $0x30] sm:$0xff]  ;;  %v99_v13 = vld [vmem:[%s622_s1 + $0x38] sm:$0xff] }
   0x4   :  { %452 = vmatpush3.bf16.msra.mxu0 %v451_v4  ;;  %v460_v14 = vpack.c.bf16 %v99_v13, %v98_v12  ;;  %v100_v15 = vld [vmem:[%s622_s1 + $0x40] sm:$0xff]  ;;  %v101_v16 = vld [vmem:[%s622_s1 + $0x48] sm:$0xff]  ;;  %v177_v18 = vld [vmem:[%s622_s1 + $0x50] sm:$0xff] }
   0x5   :  { %455 = vmatpush3.bf16.msra.mxu1 %v454_v8  ;;  %465 = vmatprep.subr.bf16.mxu0 %v496_v0  ;;  %v463_v17 = vpack.c.bf16 %v101_v16, %v100_v15  ;;  %v178_v19 = vld [vmem:[%s622_s1 + $0x58] sm:$0xff]  ;;  %v179_v20 = vld [vmem:[%s622_s1 + $0x60] sm:$0xff]  ;;  %v180_v22 = vld [vmem:[%s622_s1 + $0x68] sm:$0xff] }
   0x6   :  { %456 = vmatprep.subr.bf16.mxu1 %v496_v0  ;;  %v466_v21 = vpack.c.bf16 %v178_v19, %v177_v18  ;;  %v469_v23 = vpack.c.bf16 %v180_v22, %v179_v20  ;;  %v181_v24 = vld [vmem:[%s622_s1 + $0x70] sm:$0xff]  ;;  %v182_v25 = vld [vmem:[%s622_s1 + $0x78] sm:$0xff]  ;;  %v183_v32 = vld [vmem:[%s622_s1 + $0x80] sm:$0xff] }
   0x7   :  { %391 = vmatmul.mubr.msk.f32.vlgmr.msra.gmra.mrb[0].mxu0 %vm19_vm1, %v11_v10  ;;  %v472_v26 = vpack.c.bf16 %v182_v25, %v181_v24  ;;  %v351_v27 = vld [vmem:[%s622_s1 + $0xd0] ss:$0 sm:$0xff]  ;;  %v184_v33 = vld [vmem:[%s622_s1 + $0x88] sm:$0xff]  ;;  %v260_v36 = vld [vmem:[%s622_s1 + $0x98] sm:$0xff] }
   0x8   :  { %428 = vmatprep.mubr.msk.f32.mxu0 %vm497_vm0, %v498_v3  ;;  %467 = vmatpush3.bf16.msra.mxu0 %v466_v21  ;;  %v475_v34 = vpack.c.bf16 %v184_v33, %v183_v32  ;;  %v259_v35 = vld [vmem:[%s622_s1 + $0x90] sm:$0xff]  ;;  %v261_v37 = vld [vmem:[%s622_s1 + $0xa0] sm:$0xff]  ;;  %v262_v39 = vld [vmem:[%s622_s1 + $0xa8] sm:$0xff] }
   0x9   :  { %458 = vmatpush3.bf16.msra.mxu1 %v457_v11  ;;  %468 = vmatprep.subr.bf16.mxu0 %v496_v0  ;;  %v478_v38 = vpack.c.bf16 %v260_v36, %v259_v35  ;;  %v481_v40 = vpack.c.bf16 %v262_v39, %v261_v37  ;;  %v263_v41 = vld [vmem:[%s622_s1 + $0xb0] sm:$0xff]  ;;  %v264_v42 = vld [vmem:[%s622_s1 + $0xb8] sm:$0xff]  ;;  %v265_v47 = vld [vmem:[%s622_s1 + $0xc0] sm:$0xff] }
   0xa   :  { %459 = vmatprep.subr.bf16.mxu1 %v496_v0  ;;  %v484_v43 = vpack.c.bf16 %v264_v42, %v263_v41  ;;  %v266_v48 = vld [vmem:[%s622_s1 + $0xc8] sm:$0xff] }
   0xb   :  { %v487_v49 = vpack.c.bf16 %v266_v48, %v265_v47 }
   0xc   :  { %470 = vmatpush3.bf16.msra.mxu0 %v469_v23 }
   0xd   :  { %461 = vmatpush3.bf16.msra.mxu1 %v460_v14  ;;  %471 = vmatprep.subr.bf16.mxu0 %v496_v0 }
   0xe   :  { %462 = vmatprep.subr.bf16.mxu1 %v496_v0 }
  0x10   :  { %473 = vmatpush3.bf16.msra.mxu0 %v472_v26 }
  0x11   :  { %464 = vmatpush3.bf16.msra.mxu1 %v463_v17  ;;  %474 = vmatprep.subr.bf16.mxu0 %v496_v0 }
  0x12   :  { %477 = vmatprep.subr.bf16.mxu1 %v496_v0 }
  0x14   :  { %476 = vmatpush3.bf16.msra.mxu0 %v475_v34 }
  0xda   :  { %v89_v28 = vpop.f32.mrb[0].mxu0 }
  0xdb   :  { %v90_v29 = vadd.f32 %v351_v27, %v89_v28  ;;  %v392_v30 = vpop.f32.mrb[1].mxu0 }
  0xdd   :  { %v93_v31 = vmax.f32 %v90_v29, 0.0 }
  0xdf   :  { %410 = vmatmul.mubr.msk.f32.vlgmr.msra.gmra.mrb[0].mxu1 %vm102_vm2, %v93_v31 }
  0xe0   :  { %447 = vmatprep.mubr.msk.f32.mxu1 %vm497_vm0, %v498_v3  ;;  %479 = vmatpush3.bf16.msra.mxu1 %v478_v38 }
  0xe1   :  { %480 = vmatprep.subr.bf16.mxu1 %v496_v0 }
  0xe4   :  { %482 = vmatpush3.bf16.msra.mxu1 %v481_v40 }
  0xe5   :  { %483 = vmatprep.subr.bf16.mxu1 %v496_v0 }
  0xe8   :  { %485 = vmatpush3.bf16.msra.mxu1 %v484_v43 }
  0xe9   :  { %486 = vmatprep.subr.bf16.mxu1 %v496_v0 }
  0xec   :  { %488 = vmatpush3.bf16.msra.mxu1 %v487_v49 }
 0x1b2   :  { %v172_v44 = vpop.f32.mrb[0].mxu1 }
 0x1b3   :  { %v176_v45 = vmax.f32 %v172_v44, 0.0  ;;  %v411_v46 = vpop.f32.mrb[1].mxu1 }
 0x1b5   :  { %429 = vmatmul.mubr.msk.f32.vlgmr.msra.gmra.mrb[2].mxu0 %vm102_vm2, %v176_v45 }
 0x288   :  { %v254_v50 = vpop.f32.mrb[2].mxu0 }
 0x289   :  { %v258_v51 = vmax.f32 %v254_v50, 0.0  ;;  %v430_v52 = vpop.f32.mrb[3].mxu0 }
 0x28b   :  { %448 = vmatmul.mubr.msk.f32.vlgmr.msra.gmra.mrb[2].mxu1 %vm102_vm2, %v258_v51 }
 0x35e   :  { %v336_v53 = vpop.f32.mrb[2].mxu1 }
 0x35f   :  { %v340_v54 = vsub.f32 0.0, %v336_v53  ;;  %v449_v55 = vpop.f32.mrb[3].mxu1 }
 0x361   :  { %v341_v56 = vmul.f32 1.442695, %v340_v54 }
 0x363   :  { %492 = vpow2.f32 %v341_v56 }
 0x36d   :  { %v493_v57 = vpop.eup %492 }
 0x36e   :  { %v343_v58 = vadd.f32 1.0, %v493_v57 }
 0x370   :  { %494 = vrcp.f32 %v343_v58 }
 0x37a   :  { %v495_v59 = vpop.eup %494 }
 0x37b   :  { %v345_v60 = vadd.f32 %v495_v59, %v254_v50 }
 0x37d   :  { %346 = vst.msk [vmem:[%s624_s2] sm:$0xff] %vm102_vm2, %v345_v60 }

</bundles_post_ra>
